<compile_context>
chip_gen: v7x
topology: tpu7x:2x2x1
jax: 0.10.0
libtpu: 0.0.40
codegen_flags: <defaults>
</compile_context>

<pallas_src>
import jax
import jax.numpy as jnp
from jax.experimental import pallas as pl
from jax.experimental.pallas import tpu as pltpu

LANE = 128  # TPU lane width: feature (last) dims are padded to a multiple of this.


def _round_up(v, m):
    return ((v + m - 1) // m) * m


# --------------------------------------------------------------------------- #
# Kernel
# --------------------------------------------------------------------------- #
def mlp_kernel(x_ref, w1_ref, b1_ref, w2_ref, b2_ref, w3_ref, b3_ref, o_ref):
    # In-kernel bf16 cast of x (VPU work that overlaps the MXU) -> no separate
    # pad+cast pass over x in the wrapper.
    x = x_ref[...].astype(w1_ref.dtype)

    # Layer 1: MXU matmul, f32 accumulation; bias + ReLU in bf16 (the value is
    # cast to bf16 for the next matmul anyway; halves epilogue bytes on v6e/v7x).
    h1 = jnp.dot(x, w1_ref[...], preferred_element_type=jnp.float32)
    h1 = jnp.maximum(h1.astype(b1_ref.dtype) + b1_ref[...], 0.0)

    # Layer 2
    h2 = jnp.dot(h1, w2_ref[...], preferred_element_type=jnp.float32)
    h2 = jnp.maximum(h2.astype(b2_ref.dtype) + b2_ref[...], 0.0)

    # Layer 3 (no activation, matches PyTorch forward); final bias add in f32.
    out = jnp.dot(h2, w3_ref[...], preferred_element_type=jnp.float32)
    o_ref[...] = (out + b3_ref[...]).astype(o_ref.dtype)


# --------------------------------------------------------------------------- #
# One-time parameter preparation (pad to 128 lanes, cast to MXU operand dtype)
# --------------------------------------------------------------------------- #
def prepare_params(params, operand_dtype=jnp.bfloat16):
    """Pad/cast params ONCE (at init), not per forward call.

    Zero padding preserves semantics: padded input columns are zero in x,
    padded hidden units get zero weight + zero bias -> ReLU(0)=0 -> contribute
    nothing downstream; padded class columns are sliced off in the wrapper.
    """
    w1, b1, w2, b2, w3, b3 = params
    in_size, hidden1 = w1.shape
    assert w2.shape[0] == hidden1 and w3.shape[0] == w2.shape[1]
    hidden2 = w2.shape[1]
    num_classes = w3.shape[1]

    ip = _round_up(in_size, LANE)
    h1p = _round_up(hidden1, LANE)
    h2p = _round_up(hidden2, LANE)
    cp = _round_up(num_classes, LANE)

    def pad2(a, rows, cols, dtype):
        return jnp.pad(a, ((0, rows - a.shape[0]), (0, cols - a.shape[1]))).astype(dtype)

    padded = dict(
        w1=pad2(w1, ip, h1p, operand_dtype),
        b1=pad2(b1, 1, h1p, operand_dtype),   # bf16 epilogue (bias + ReLU)
        w2=pad2(w2, h1p, h2p, operand_dtype),
        b2=pad2(b2, 1, h2p, operand_dtype),
        w3=pad2(w3, h2p, cp, operand_dtype),
        b3=pad2(b3, 1, cp, jnp.float32),      # final bias add stays f32
    )
    dims = dict(in_size=in_size, num_classes=num_classes,
                ip=ip, h1p=h1p, h2p=h2p, cp=cp)
    return padded, dims


# --------------------------------------------------------------------------- #
# Generation-aware tiling / VMEM plan
# --------------------------------------------------------------------------- #
def _vmem_capacity_bytes():
    try:
        return int(pltpu.get_tpu_info().vmem_capacity_bytes)
    except Exception:
        return 128 * 1024 * 1024  # conservative v5e/v6e default


def _plan_tiling(batch, ip, h1p, h2p, cp, op_itemsize, x_itemsize, out_itemsize):
    cap = _vmem_capacity_bytes()
    usable = int(cap * 0.75)                    # ~96 MiB on v5e/v6e, ~48 MiB on v7x
    tm_cap = 256 if cap <= (96 << 20) else 512  # smaller batch tiles on v7x (64 MiB VMEM)

    # Batch tile sized to the batch (16-row granularity); when possible split
    # into >=2 grid steps so the "parallel" axis can feed both v7x TensorCores.
    if batch <= 16:
        tm = 16
    else:
        tm = min(tm_cap, _round_up((batch + 1) // 2, 16))

    weights = (ip * h1p + h1p * h2p + h2p * cp) * op_itemsize  # single-buffered
    biases = (h1p + h2p) * op_itemsize + cp * 4

    def footprint(tm_, x_bufs):
        return (weights + biases
                + x_bufs * tm_ * ip * x_itemsize        # pipelined x tiles
                + 2 * tm_ * cp * out_itemsize           # double-buffered out tiles
                + 2 * tm_ * max(h1p, h2p) * 4)          # f32 accumulator temporaries

    # Shrink the batch tile (never the weight residency) until it fits VMEM.
    while footprint(tm, 2) > usable and tm > 16:
        tm = max(16, _round_up(tm // 2, 16))
    # TODO(synk): if the resident weights alone exceed `usable` (hidden >= ~4K
    # bf16 on v7x), tile the hidden/K axis with an f32 VMEM accumulator instead.

    bp = _round_up(batch, tm)
    steps = bp // tm

    # Deepen the x pipeline when there are many small steps (DMA-bound regime).
    x_bufs = 3 if (steps >= 4 and footprint(tm, 3) <= usable) else 2

    vmem_limit = int(min(usable, max(16 * 1024 * 1024, int(1.5 * footprint(tm, x_bufs)))))
    return tm, bp, steps, x_bufs, vmem_limit


# --------------------------------------------------------------------------- #
# Forward pass
# --------------------------------------------------------------------------- #
def neural_net_forward(x, prepared, *, out_dtype=jnp.float32):
    padded, dims = prepared
    batch, in_size = x.shape
    assert in_size == dims["in_size"]
    ip, h1p, h2p, cp = dims["ip"], dims["h1p"], dims["h2p"], dims["cp"]

    op_itemsize = jnp.dtype(padded["w1"].dtype).itemsize
    tm, bp, steps, x_bufs, vmem_limit = _plan_tiling(
        batch, ip, h1p, h2p, cp,
        op_itemsize, jnp.dtype(x.dtype).itemsize, jnp.dtype(out_dtype).itemsize)

    # Pad x only when actually needed; dtype cast happens inside the kernel.
    xp = x
    if bp != batch or ip != in_size:
        xp = jnp.pad(x, ((0, bp - batch), (0, ip - in_size)))

    # Weights/biases VMEM-resident (constant index_map, single buffer);
    # x/out tiled over the batch and pipelined.
    def resident(shape):
        return pl.BlockSpec(shape, lambda i: (0, 0), pipeline_mode=pl.Buffered(1))

    in_specs = [
        pl.BlockSpec((tm, ip), lambda i: (i, 0), pipeline_mode=pl.Buffered(x_bufs)),
        resident((ip, h1p)), resident((1, h1p)),
        resident((h1p, h2p)), resident((1, h2p)),
        resident((h2p, cp)), resident((1, cp)),
    ]
    out_specs = pl.BlockSpec((tm, cp), lambda i: (i, 0))

    flops = 2 * bp * (ip * h1p + h1p * h2p + h2p * cp)
    bytes_accessed = (xp.size * jnp.dtype(xp.dtype).itemsize
                      + sum(v.size * jnp.dtype(v.dtype).itemsize for v in padded.values())
                      + bp * cp * jnp.dtype(out_dtype).itemsize)
    cost = pl.CostEstimate(flops=flops, transcendentals=0, bytes_accessed=bytes_accessed)

    out_padded = pl.pallas_call(
        mlp_kernel,
        grid=(steps,),
        in_specs=in_specs,
        out_specs=out_specs,
        out_shape=jax.ShapeDtypeStruct((bp, cp), out_dtype),
        compiler_params=pltpu.CompilerParams(
            dimension_semantics=("parallel",),   # batch tiles shard across TCs on v7x
            vmem_limit_bytes=vmem_limit,
        ),
        cost_estimate=cost,
    )(xp, padded["w1"], padded["b1"], padded["w2"], padded["b2"],
      padded["w3"], padded["b3"])

    # Lane-dense padded output in-kernel; real (batch, num_classes) slice here (free).
    return out_padded[:batch, :dims["num_classes"]]


# --------------------------------------------------------------------------- #
# Reference + init (mirrors PyTorch nn.Linear default init)
# --------------------------------------------------------------------------- #
def init_params(key, input_size, hidden_size, num_classes):
    keys = jax.random.split(key, 6)

    def linear(kw, kb, fan_in, fan_out):
        bound = 1.0 / jnp.sqrt(jnp.float32(fan_in))
        w = jax.random.uniform(kw, (fan_in, fan_out), jnp.float32, -bound, bound)
        b = jax.random.uniform(kb, (1, fan_out), jnp.float32, -bound, bound)
        return w, b

    w1, b1 = linear(keys[0], keys[1], input_size, hidden_size)
    w2, b2 = linear(keys[2], keys[3], hidden_size, hidden_size)
    w3, b3 = linear(keys[4], keys[5], hidden_size, num_classes)
    return (w1, b1, w2, b2, w3, b3)


def reference_forward(x, params):
    w1, b1, w2, b2, w3, b3 = params
    h1 = jnp.maximum(x @ w1 + b1, 0.0)
    h2 = jnp.maximum(h1 @ w2 + b2, 0.0)
    return h2 @ w3 + b3


if __name__ == "__main__":
    input_size, hidden_size, num_classes = 32, 32, 10
    batch = 8

    key = jax.random.PRNGKey(0)
    kx, kp = jax.random.split(key)
    x = jax.random.normal(kx, (batch, input_size), jnp.float32)
    params = init_params(kp, input_size, hidden_size, num_classes)

    prepared = prepare_params(params)  # pad + bf16-cast weights ONCE
    out = jax.block_until_ready(neural_net_forward(x, prepared))
    ref = reference_forward(x, params)

    assert out.shape == (batch, num_classes)
    # bf16 MXU operands / bf16 hidden epilogue (f32 accumulation) vs f32 reference.
    assert jnp.allclose(out, ref, atol=5e-2, rtol=5e-2), float(jnp.max(jnp.abs(out - ref)))

    print("KERNEL_OK")
</pallas_src>

<mosaic_0001>
module attributes {stable_mosaic.version = 11 : i64} {
  func.func @mlp_kernel(%arg0: i32, %arg1: memref<16x128xf32, #tpu.memory_space<vmem>>, %arg2: memref<128x128xbf16, #tpu.memory_space<vmem>>, %arg3: memref<1x128xbf16, #tpu.memory_space<vmem>>, %arg4: memref<128x128xbf16, #tpu.memory_space<vmem>>, %arg5: memref<1x128xbf16, #tpu.memory_space<vmem>>, %arg6: memref<128x128xbf16, #tpu.memory_space<vmem>>, %arg7: memref<1x128xf32, #tpu.memory_space<vmem>>, %arg8: memref<16x128xf32, #tpu.memory_space<vmem>>) attributes {dimension_semantics = [#tpu.dimension_semantics<parallel>], iteration_bounds = array<i64: 1>, scalar_prefetch = 0 : i64, scratch_operands = 0 : i64, tpu.core_type = #tpu.core_type<tc>, window_params = [{pipeline_mode = #tpu.pipeline_mode<double_buffered>, transform_indices = @transform_0, window_bounds = array<i64: 16, 128>}, {pipeline_mode = #tpu.pipeline_mode<synchronous>, transform_indices = @transform_1, window_bounds = array<i64: 128, 128>}, {pipeline_mode = #tpu.pipeline_mode<synchronous>, transform_indices = @transform_2, window_bounds = array<i64: 1, 128>}, {pipeline_mode = #tpu.pipeline_mode<synchronous>, transform_indices = @transform_3, window_bounds = array<i64: 128, 128>}, {pipeline_mode = #tpu.pipeline_mode<synchronous>, transform_indices = @transform_4, window_bounds = array<i64: 1, 128>}, {pipeline_mode = #tpu.pipeline_mode<synchronous>, transform_indices = @transform_5, window_bounds = array<i64: 128, 128>}, {pipeline_mode = #tpu.pipeline_mode<synchronous>, transform_indices = @transform_6, window_bounds = array<i64: 1, 128>}, {transform_indices = @transform_7, window_bounds = array<i64: 16, 128>}]} {
    %c0 = arith.constant 0 : index
    %c0_0 = arith.constant 0 : index
    %0 = vector.load %arg1[%c0, %c0_0] : memref<16x128xf32, #tpu.memory_space<vmem>>, vector<16x128xf32>
    %1 = arith.truncf %0 : vector<16x128xf32> to vector<16x128xbf16>
    %c0_1 = arith.constant 0 : index
    %c0_2 = arith.constant 0 : index
    %2 = vector.load %arg2[%c0_1, %c0_2] : memref<128x128xbf16, #tpu.memory_space<vmem>>, vector<128x128xbf16>
    %cst = arith.constant dense<0.000000e+00> : vector<16x128xf32>
    %3 = tpu.matmul %1, %2, %cst {dimension_numbers = #tpu.dot_dimension_numbers<[1], [0], [0], [1], [0, 0, 1, 1], [], []>} : vector<16x128xbf16>, vector<128x128xbf16>, vector<16x128xf32> -> vector<16x128xf32>
    %4 = arith.truncf %3 : vector<16x128xf32> to vector<16x128xbf16>
    %c0_3 = arith.constant 0 : index
    %c0_4 = arith.constant 0 : index
    %5 = vector.load %arg3[%c0_3, %c0_4] : memref<1x128xbf16, #tpu.memory_space<vmem>>, vector<1x128xbf16>
    %6 = vector.broadcast %5 : vector<1x128xbf16> to vector<16x128xbf16>
    %7 = arith.addf %4, %6 : vector<16x128xbf16>
    %cst_5 = arith.constant 0.000000e+00 : bf16
    %8 = vector.broadcast %cst_5 : bf16 to vector<16x128xbf16>
    %9 = arith.maximumf %7, %8 : vector<16x128xbf16>
    %c0_6 = arith.constant 0 : index
    %c0_7 = arith.constant 0 : index
    %10 = vector.load %arg4[%c0_6, %c0_7] : memref<128x128xbf16, #tpu.memory_space<vmem>>, vector<128x128xbf16>
    %cst_8 = arith.constant dense<0.000000e+00> : vector<16x128xf32>
    %11 = tpu.matmul %9, %10, %cst_8 {dimension_numbers = #tpu.dot_dimension_numbers<[1], [0], [0], [1], [0, 0, 1, 1], [], []>} : vector<16x128xbf16>, vector<128x128xbf16>, vector<16x128xf32> -> vector<16x128xf32>
    %12 = arith.truncf %11 : vector<16x128xf32> to vector<16x128xbf16>
    %c0_9 = arith.constant 0 : index
    %c0_10 = arith.constant 0 : index
    %13 = vector.load %arg5[%c0_9, %c0_10] : memref<1x128xbf16, #tpu.memory_space<vmem>>, vector<1x128xbf16>
    %14 = vector.broadcast %13 : vector<1x128xbf16> to vector<16x128xbf16>
    %15 = arith.addf %12, %14 : vector<16x128xbf16>
    %cst_11 = arith.constant 0.000000e+00 : bf16
    %16 = vector.broadcast %cst_11 : bf16 to vector<16x128xbf16>
    %17 = arith.maximumf %15, %16 : vector<16x128xbf16>
    %c0_12 = arith.constant 0 : index
    %c0_13 = arith.constant 0 : index
    %18 = vector.load %arg6[%c0_12, %c0_13] : memref<128x128xbf16, #tpu.memory_space<vmem>>, vector<128x128xbf16>
    %cst_14 = arith.constant dense<0.000000e+00> : vector<16x128xf32>
    %19 = tpu.matmul %17, %18, %cst_14 {dimension_numbers = #tpu.dot_dimension_numbers<[1], [0], [0], [1], [0, 0, 1, 1], [], []>} : vector<16x128xbf16>, vector<128x128xbf16>, vector<16x128xf32> -> vector<16x128xf32>
    %c0_15 = arith.constant 0 : index
    %c0_16 = arith.constant 0 : index
    %20 = vector.load %arg7[%c0_15, %c0_16] : memref<1x128xf32, #tpu.memory_space<vmem>>, vector<1x128xf32>
    %21 = vector.broadcast %20 : vector<1x128xf32> to vector<16x128xf32>
    %22 = arith.addf %19, %21 : vector<16x128xf32>
    %c0_17 = arith.constant 0 : index
    %c0_18 = arith.constant 0 : index
    %23 = vector.load %arg8[%c0_17, %c0_18] : memref<16x128xf32, #tpu.memory_space<vmem>>, vector<16x128xf32>
    tpu.vector_store %arg8[%c0_17, %c0_18], %22 {strides = array<i32>} : memref<16x128xf32, #tpu.memory_space<vmem>>, vector<16x128xf32>,
    return
  }
  func.func @transform_0(%arg0: i32) -> (i32, i32) {
    %c0_i32 = arith.constant 0 : i32
    %c0_i32_0 = arith.constant 0 : i32
    return %arg0, %c0_i32 : i32, i32
  }
  func.func @transform_1(%arg0: i32) -> (i32, i32) {
    %c0_i32 = arith.constant 0 : i32
    %c0_i32_0 = arith.constant 0 : i32
    %c0_i32_1 = arith.constant 0 : i32
    return %c0_i32, %c0_i32_0 : i32, i32
  }
  func.func @transform_2(%arg0: i32) -> (i32, i32) {
    %c0_i32 = arith.constant 0 : i32
    %c0_i32_0 = arith.constant 0 : i32
    %c0_i32_1 = arith.constant 0 : i32
    return %c0_i32, %c0_i32_0 : i32, i32
  }
  func.func @transform_3(%arg0: i32) -> (i32, i32) {
    %c0_i32 = arith.constant 0 : i32
    %c0_i32_0 = arith.constant 0 : i32
    %c0_i32_1 = arith.constant 0 : i32
    return %c0_i32, %c0_i32_0 : i32, i32
  }
  func.func @transform_4(%arg0: i32) -> (i32, i32) {
    %c0_i32 = arith.constant 0 : i32
    %c0_i32_0 = arith.constant 0 : i32
    %c0_i32_1 = arith.constant 0 : i32
    return %c0_i32, %c0_i32_0 : i32, i32
  }
  func.func @transform_5(%arg0: i32) -> (i32, i32) {
    %c0_i32 = arith.constant 0 : i32
    %c0_i32_0 = arith.constant 0 : i32
    %c0_i32_1 = arith.constant 0 : i32
    return %c0_i32, %c0_i32_0 : i32, i32
  }
  func.func @transform_6(%arg0: i32) -> (i32, i32) {
    %c0_i32 = arith.constant 0 : i32
    %c0_i32_0 = arith.constant 0 : i32
    %c0_i32_1 = arith.constant 0 : i32
    return %c0_i32, %c0_i32_0 : i32, i32
  }
  func.func @transform_7(%arg0: i32) -> (i32, i32) {
    %c0_i32 = arith.constant 0 : i32
    %c0_i32_0 = arith.constant 0 : i32
    return %arg0, %c0_i32 : i32, i32
  }
}

</mosaic_0001>

<bundles_post_ra>
// kernel: tpu_custom_call.1
= control target key start
LH: loop header
LB: loop body
LE: loop exit
PB: predicated region body
PF: predicated region fallthrough
CT: control target
= control target key end

     0   :  { %12 = vsyncpa [#allocation3], 0  ;;  %s890_s0 = inlined_call_operand.hbm [shape: f32[16,128], index: 0, kind: input, shape index: {}]   ;;  %s891_s1 = inlined_call_operand.hbm [shape: bf16[128,128], index: 1, kind: input, shape index: {}]   ;;  %s892_s2 = inlined_call_operand.vmem [shape: bf16[1,128], index: 2, kind: input, shape index: {}]   ;;  %s893_s3 = inlined_call_operand.hbm [shape: bf16[128,128], index: 3, kind: input, shape index: {}]   ;;  %s894_s4 = inlined_call_operand.vmem [shape: bf16[1,128], index: 4, kind: input, shape index: {}]   ;;  %s895_s5 = inlined_call_operand.hbm [shape: bf16[128,128], index: 5, kind: input, shape index: {}]   ;;  %s896_s6 = inlined_call_operand.vmem [shape: f32[1,128], index: 6, kind: input, shape index: {}]   ;;  %s897_s7 = inlined_call_operand.hbm [shape: f32[16,128], index: 7, kind: output, shape index: {}]  }
   0x1   :  { %13 = vsyncpa [#allocation6], 0 }
   0x2   :  { %14 = vsyncpa [#allocation9], 0 }
   0x3   :  { %15 = vsyncpa [#allocation4], 0  ;;  %s717_s24 = smov [#allocation5]   ;;  %s599_s28 = scalar_lea.hbm %s891_s1, 1024 }
   0x4   :  { %s33_s25 = sshll.u32 %s717_s24, 4  ;;  %p600_p0 = scmp.ne.s32.totalorder %s891_s1, %s599_s28  ;;  %s34_s25 = int_to_ptr.vmem [resolvable:$true] %s33_s25 }
   0x5   :  { %p603_p1 = scmp.lt.u32.totalorder %s599_s28, %s891_s1 }
   0x7   :  { %p605_p2 = pnand %p603_p1, %p600_p0 }
   0x9   :  { %608 = shalt.err (!%p605_p2)
}
   0xa   :  { %s609_s10 = scalar_lea.vmem %s34_s25, 1024  ;;  %p614_p4 = scmp.lt.s32.totalorder %s34_s25, %s34_s25 }
   0xb   :  { %p610_p3 = scmp.ne.s32.totalorder %s34_s25, %s609_s10  ;;  %p615_p5 = scmp.lt.s32.totalorder %s609_s10, %s609_s10 }
   0xd   :  { %p616_p6 = por %p615_p5, %p614_p4 }
   0xf   :  { %p617_p7 = pnand %p616_p6, %p610_p3 }
  0x11   :  { %620 = shalt.err (!%p617_p7)
}
  0x12   :  { %s718_s11 = smov 64   ;;  %s719_s12 = smov 4  }
  0x13   :  { %39 = dma.hbm_to_vmem [thread:$0]  %s891_s1, 1024, %s34_s25, [#allocation6], %s718_s11, %s718_s11, %s719_s12  }
  0x14   :  { %s720_s15 = smov [#allocation2]   ;;  %s621_s19 = scalar_lea.hbm %s890_s0, 256 }
  0x15   :  { %s21_s16 = sshll.u32 %s720_s15, 4  ;;  %p622_p8 = scmp.ne.s32.totalorder %s890_s0, %s621_s19  ;;  %s22_s16 = int_to_ptr.vmem [resolvable:$true] %s21_s16 }
  0x16   :  { %p625_p9 = scmp.lt.u32.totalorder %s621_s19, %s890_s0 }
  0x18   :  { %p627_p10 = pnand %p625_p9, %p622_p8 }
  0x1a   :  { %630 = shalt.err (!%p627_p10)
}
  0x1b   :  { %s631_s24 = scalar_lea.vmem %s22_s16, 256  ;;  %p636_p12 = scmp.lt.s32.totalorder %s22_s16, %s22_s16 }
  0x1c   :  { %p632_p11 = scmp.ne.s32.totalorder %s22_s16, %s631_s24  ;;  %p637_p13 = scmp.lt.s32.totalorder %s631_s24, %s631_s24 }
  0x1e   :  { %p638_p0 = por %p637_p13, %p636_p12 }
  0x20   :  { %p639_p1 = pnand %p638_p0, %p632_p11 }
  0x22   :  { %642 = shalt.err (!%p639_p1)
}
  0x23   :  { %s721_s1 = smov 128   ;;  %s722_s25 = smov 8  }
  0x24   :  { %27 = dma.hbm_to_vmem [thread:$0]  %s890_s0, 256, %s22_s16, [#allocation3], %s721_s1, %s721_s1, %s722_s25  }
  0x25   :  { %s723_s28 = smov [#allocation7]   ;;  %s724_s30 = smov [#allocation8]  }
  0x26   :  { %s47_s29 = sshll.u32 %s723_s28, 4  ;;  %s61_s8 = sshll.u32 %s724_s30, 4  ;;  %s48_s29 = int_to_ptr.vmem [resolvable:$true] %s47_s29  ;;  %s799_s8 = int_to_ptr.vmem [resolvable:$true] %s61_s8 }
  0x27   :  { %s643_s13 = scalar_lea.hbm %s893_s3, 1024 }
  0x28   :  { %p644_p2 = scmp.ne.s32.totalorder %s893_s3, %s643_s13  ;;  %p647_p3 = scmp.lt.u32.totalorder %s643_s13, %s893_s3 }
  0x2a   :  { %p649_p4 = pnand %p647_p3, %p644_p2 }
  0x2c   :  { %652 = shalt.err (!%p649_p4)
}
  0x2d   :  { %s653_s0 = scalar_lea.vmem %s48_s29, 1024  ;;  %p658_p6 = scmp.lt.s32.totalorder %s48_s29, %s48_s29 }
  0x2e   :  { %p654_p5 = scmp.ne.s32.totalorder %s48_s29, %s653_s0  ;;  %p659_p7 = scmp.lt.s32.totalorder %s653_s0, %s653_s0 }
  0x30   :  { %p660_p8 = por %p659_p7, %p658_p6 }
  0x32   :  { %p661_p9 = pnand %p660_p8, %p654_p5 }
  0x34   :  { %664 = shalt.err (!%p661_p9)
}
  0x35   :  { %53 = dma.hbm_to_vmem [thread:$0]  %s893_s3, 1024, %s48_s29, [#allocation6], %s718_s11, %s718_s11, %s719_s12  }
  0x36   :  { %s665_s22 = scalar_lea.hbm %s895_s5, 1024 }
  0x37   :  { %p666_p10 = scmp.ne.s32.totalorder %s895_s5, %s665_s22  ;;  %p669_p11 = scmp.lt.u32.totalorder %s665_s22, %s895_s5 }
  0x39   :  { %p671_p12 = pnand %p669_p11, %p666_p10 }
  0x3b   :  { %674 = shalt.err (!%p671_p12)
}
  0x3c   :  { %s675_s28 = scalar_lea.vmem %s799_s8, 1024  ;;  %p680_p0 = scmp.lt.s32.totalorder %s799_s8, %s799_s8 }
  0x3d   :  { %p676_p13 = scmp.ne.s32.totalorder %s799_s8, %s675_s28  ;;  %p681_p1 = scmp.lt.s32.totalorder %s675_s28, %s675_s28 }
  0x3f   :  { %p682_p2 = por %p681_p1, %p680_p0 }
  0x41   :  { %p683_p3 = pnand %p682_p2, %p676_p13 }
  0x43   :  { %686 = shalt.err (!%p683_p3)
}
  0x44   :  { %67 = dma.hbm_to_vmem [thread:$0]  %s895_s5, 1024, %s799_s8, [#allocation9], %s718_s11, %s718_s11, %s719_s12  }
  0x45   :  { %709 = dma.done.wait [#allocation3], 256  }
  0x46   :  { %710 = vsyncadd [#allocation3], 4294967040 }
  0x47   :  { %711 = dma.done.wait [#allocation6], 2048  }
  0x48   :  { %712 = vsyncadd [#allocation6], 4294965248 }
  0x49   :  { %713 = dma.done.wait [#allocation9], 1024  }
  0x4a   :  { %714 = vsyncadd [#allocation9], 4294966272  ;;  %v725_v0 = vmov 0.0   ;;  %vm726_vm0 = vmmov 0   ;;  %v575_v1 = vld [vmem:[#allocation5] sm:$0xff]   ;;  %v576_v2 = vld [vmem:[#allocation5 + $0x8] sm:$0xff]   ;;  %v196_v26 = vlaneseq }
  0x4b   :  { %503 = vmatprep.subr.bf16.mxu0 %v725_v0  ;;  %519 = vmatprep.mubr.msk.bf16.mxu0 %vm726_vm0, %v725_v0  ;;  %v577_v3 = vld [vmem:[#allocation5 + $0x10] sm:$0xff]   ;;  %v583_v4 = vld [vmem:[#allocation7] sm:$0xff]   ;;  %v578_v5 = vld [vmem:[#allocation5 + $0x18] sm:$0xff]   ;;  %v727_v38 = vmov 0   ;;  %s728_s9 = smov [#allocation10]  }
  0x4c   :  { %523 = vmatprep.subr.bf16.mxu1 %v725_v0  ;;  %539 = vmatprep.mubr.msk.bf16.mxu1 %vm726_vm0, %v725_v0  ;;  %v584_v6 = vld [vmem:[#allocation7 + $0x8] sm:$0xff]   ;;  %v579_v7 = vld [vmem:[#allocation5 + $0x20] sm:$0xff]   ;;  %v585_v8 = vld [vmem:[#allocation7 + $0x10] sm:$0xff]   ;;  %v197_v27 = vshrl.u32 %v196_v26, 7  ;;  %s437_s10 = sshll.u32 %s728_s9, 4  ;;  %s438_s10 = int_to_ptr.vmem [resolvable:$true] %s437_s10 }
  0x4d   :  { %504 = vmatpush3.bf16.msra.mxu0 %v575_v1  ;;  %524 = vmatpush3.bf16.msra.mxu1 %v583_v4  ;;  %v580_v9 = vld [vmem:[#allocation5 + $0x28] sm:$0xff]   ;;  %v586_v10 = vld [vmem:[#allocation7 + $0x18] sm:$0xff]   ;;  %v581_v11 = vld [vmem:[#allocation5 + $0x30] sm:$0xff]   ;;  %p692_p5 = scmp.lt.s32.totalorder %s438_s10, %s438_s10 }
  0x4e   :  { %505 = vmatprep.subr.bf16.mxu0 %v725_v0  ;;  %525 = vmatprep.subr.bf16.mxu1 %v725_v0  ;;  %v587_v12 = vld [vmem:[#allocation7 + $0x20] sm:$0xff]   ;;  %v582_v13 = vld [vmem:[#allocation5 + $0x38] sm:$0xff]   ;;  %v83_v14 = vld [vmem:[#allocation2] sm:$0xff]  ;;  %v198_v30 = vsub.s32 0, %v197_v27 }
  0x4f   :  { %v84_v15 = vld [vmem:[#allocation2 + $0x8] sm:$0xff]  ;;  %v588_v16 = vld [vmem:[#allocation7 + $0x28] sm:$0xff]   ;;  %v589_v18 = vld [vmem:[#allocation7 + $0x30] sm:$0xff]  }
  0x50   :  { %v85_v17 = vpack.c.bf16 %v84_v15, %v83_v14  ;;  %v590_v19 = vld [vmem:[#allocation7 + $0x38] sm:$0xff]   ;;  %v591_v20 = vld [vmem:[#allocation8] sm:$0xff]   ;;  %v592_v21 = vld [vmem:[#allocation8 + $0x8] sm:$0xff]  }
  0x51   :  { %506 = vmatpush3.bf16.msra.mxu0 %v576_v2  ;;  %526 = vmatpush3.bf16.msra.mxu1 %v584_v6  ;;  %v593_v22 = vld [vmem:[#allocation8 + $0x10] sm:$0xff]   ;;  %v594_v23 = vld [vmem:[#allocation8 + $0x18] sm:$0xff]   ;;  %v595_v24 = vld [vmem:[#allocation8 + $0x20] sm:$0xff]  }
  0x52   :  { %507 = vmatprep.subr.bf16.mxu0 %v725_v0  ;;  %527 = vmatprep.subr.bf16.mxu1 %v725_v0  ;;  %v596_v25 = vld [vmem:[#allocation8 + $0x28] sm:$0xff]   ;;  %v192_v28 = vld [vmem:[%s892_s2] sm:$0x1]  ;;  %v598_v41 = vld [vmem:[#allocation8 + $0x38] sm:$0xff]  }
  0x53   :  { %v194_v29 = vpack.i.b16 %v192_v28, %v192_v28  ;;  %v597_v40 = vld [vmem:[#allocation8 + $0x30] sm:$0xff]  }
  0x54   :  { %v308_v42 = vld [vmem:[%s894_s4] sm:$0x1]  ;;  %s687_s4 = scalar_lea.vmem %s438_s10, 256 }
  0x55   :  { %508 = vmatpush3.bf16.msra.mxu0 %v577_v3  ;;  %528 = vmatpush3.bf16.msra.mxu1 %v585_v8  ;;  %v199_v33 = vrot.slane %v194_v29, %v198_v30  ;;  %v310_v43 = vpack.i.b16 %v308_v42, %v308_v42  ;;  %v467_v52 = vld [vmem:[%s896_s6] ss:$0 sm:$0xff]  ;;  %p688_p4 = scmp.ne.s32.totalorder %s438_s10, %s687_s4  ;;  %p693_p6 = scmp.lt.s32.totalorder %s687_s4, %s687_s4 }
  0x56   :  { %509 = vmatprep.subr.bf16.mxu0 %v725_v0  ;;  %529 = vmatprep.subr.bf16.mxu1 %v725_v0 }
  0x57   :  { %v315_v46 = vrot.slane %v310_v43, %v198_v30  ;;  %p694_p7 = por %p693_p6, %p692_p5 }
  0x59   :  { %510 = vmatpush3.bf16.msra.mxu0 %v578_v5  ;;  %530 = vmatpush3.bf16.msra.mxu1 %v586_v10  ;;  %p695_p8 = pnand %p694_p7, %p688_p4 }
  0x5a   :  { %511 = vmatprep.subr.bf16.mxu0 %v725_v0  ;;  %531 = vmatprep.subr.bf16.mxu1 %v725_v0 }
  0x5d   :  { %512 = vmatpush3.bf16.msra.mxu0 %v579_v7  ;;  %532 = vmatpush3.bf16.msra.mxu1 %v587_v12 }
  0x5e   :  { %513 = vmatprep.subr.bf16.mxu0 %v725_v0  ;;  %533 = vmatprep.subr.bf16.mxu1 %v725_v0 }
  0x61   :  { %514 = vmatpush3.bf16.msra.mxu0 %v580_v9  ;;  %534 = vmatpush3.bf16.msra.mxu1 %v588_v16 }
  0x62   :  { %515 = vmatprep.subr.bf16.mxu0 %v725_v0  ;;  %535 = vmatprep.subr.bf16.mxu1 %v725_v0 }
  0x65   :  { %516 = vmatpush3.bf16.msra.mxu0 %v581_v11  ;;  %536 = vmatpush3.bf16.msra.mxu1 %v589_v18 }
  0x66   :  { %517 = vmatprep.subr.bf16.mxu0 %v725_v0  ;;  %537 = vmatprep.subr.bf16.mxu1 %v725_v0 }
  0x69   :  { %518 = vmatpush3.bf16.msra.mxu0 %v582_v13  ;;  %538 = vmatpush3.bf16.msra.mxu1 %v590_v19 }
  0x6a   :  { %543 = vmatprep.subr.bf16.mxu0 %v725_v0 }
  0x6c   :  { %520 = vmatmul.mubr.bf16.vlgmr.msra.gmra.mrb[0].mxu0 %v85_v17 }
  0x6d   :  { %559 = vmatprep.mubr.msk.bf16.mxu0 %vm726_vm0, %v725_v0  ;;  %544 = vmatpush3.bf16.msra.mxu0 %v591_v20 }
  0x6e   :  { %545 = vmatprep.subr.bf16.mxu0 %v725_v0 }
  0x71   :  { %546 = vmatpush3.bf16.msra.mxu0 %v592_v21 }
  0x72   :  { %547 = vmatprep.subr.bf16.mxu0 %v725_v0 }
  0x75   :  { %548 = vmatpush3.bf16.msra.mxu0 %v593_v22 }
  0x76   :  { %549 = vmatprep.subr.bf16.mxu0 %v725_v0 }
  0x79   :  { %550 = vmatpush3.bf16.msra.mxu0 %v594_v23 }
  0x7a   :  { %551 = vmatprep.subr.bf16.mxu0 %v725_v0 }
  0x7d   :  { %552 = vmatpush3.bf16.msra.mxu0 %v595_v24 }
  0x7e   :  { %553 = vmatprep.subr.bf16.mxu0 %v725_v0 }
  0x81   :  { %554 = vmatpush3.bf16.msra.mxu0 %v596_v25 }
  0x82   :  { %555 = vmatprep.subr.bf16.mxu0 %v725_v0 }
  0x85   :  { %556 = vmatpush3.bf16.msra.mxu0 %v597_v40 }
  0x86   :  { %557 = vmatprep.subr.bf16.mxu0 %v725_v0 }
  0x89   :  { %558 = vmatpush3.bf16.msra.mxu0 %v598_v41 }
 0x13f   :  { %v184_v31 = vpop.f32.mrb[0].mxu0 }
 0x140   :  { %v521_v32 = vpop.f32.mrb[1].mxu0 }
 0x141   :  { %v187_v34 = vpop.f32.mrb[2].mxu0 }
 0x142   :  { %v191_v35 = vpack.c.bf16 %v187_v34, %v184_v31  ;;  %v522_v36 = vpop.f32.mrb[3].mxu0 }
 0x144   :  { %v200_v37 = vadd.bf16 %v199_v33, %v191_v35 }
 0x146   :  { %v201_v39 = vmax.bf16 %v727_v38, %v200_v37 }
 0x148   :  { %540 = vmatmul.mubr.bf16.vlgmr.msra.gmra.mrb[0].mxu1 %v201_v39 }
 0x21b   :  { %v300_v44 = vpop.f32.mrb[0].mxu1 }
 0x21c   :  { %v541_v45 = vpop.f32.mrb[1].mxu1 }
 0x21d   :  { %v303_v47 = vpop.f32.mrb[2].mxu1 }
 0x21e   :  { %v307_v48 = vpack.c.bf16 %v303_v47, %v300_v44  ;;  %v542_v49 = vpop.f32.mrb[3].mxu1 }
 0x220   :  { %v316_v50 = vadd.bf16 %v315_v46, %v307_v48 }
 0x222   :  { %v317_v51 = vmax.bf16 %v727_v38, %v316_v50 }
 0x224   :  { %560 = vmatmul.mubr.bf16.vlgmr.msra.gmra.mrb[4].mxu0 %v317_v51 }
 0x2f7   :  { %v423_v53 = vpop.f32.mrb[4].mxu0 }
 0x2f8   :  { %v424_v54 = vadd.f32 %v467_v52, %v423_v53  ;;  %v561_v55 = vpop.f32.mrb[5].mxu0 }
 0x2f9   :  { %v426_v56 = vpop.f32.mrb[6].mxu0 }
 0x2fa   :  { %430 = vst [vmem:[#allocation10] sm:$0xff] %v424_v54  ;;  %v427_v57 = vadd.f32 %v467_v52, %v426_v56  ;;  %v562_v58 = vpop.f32.mrb[7].mxu0 }
 0x2fc   :  { %431 = vst [vmem:[#allocation10 + $0x8] sm:$0xff] %v427_v57 }
 0x2fd   :  { %698 = shalt.err (!%p695_p8)
}
 0x2fe   :  { %s699_s14 = scalar_lea.hbm %s897_s7, 256 }
 0x2ff   :  { %p700_p9 = scmp.ne.s32.totalorder %s897_s7, %s699_s14  ;;  %p703_p10 = scmp.lt.u32.totalorder %s699_s14, %s897_s7 }
 0x301   :  { %p705_p11 = pnand %p703_p10, %p700_p9 }
 0x303   :  { %708 = shalt.err (!%p705_p11)
}
 0x304   :  { %443 = dma.vmem_to_hbm [thread:$0]  %s438_s10, 256, %s897_s7, [#allocation4], %s721_s1, %s721_s1, %s722_s25  }
 0x305   :  { %715 = dma.done.wait [#allocation4], 256  }
 0x306   :  { %716 = vsyncadd [#allocation4], 4294967040 }
 0x307   :  { %447 = vsyncpa [#allocation3], 1 }
 0x308   :  { %448 = vsyncpa [#allocation6], 1 }
 0x309   :  { %449 = vsyncpa [#allocation9], 1 }
 0x30a   :  { %450 = vsyncpa [#allocation4], 1 }

</bundles_post_ra>
